<compile_context>
chip_gen: v7x
topology: tpu7x:2x2x1
jax: 0.10.0
libtpu: 0.0.40
codegen_flags: <defaults>
</compile_context>

<pallas_src>
import functools
import math

import jax
import jax.numpy as jnp
from jax.experimental import pallas as pl
from jax.experimental.pallas import tpu as pltpu


def _pick_tile(n, preferred):
    """Largest tile <= preferred that divides n (falls back to n itself)."""
    for t in (preferred, 1024, 512, 256, 128, 64, 32, 16, 8):
        if t <= n and n % t == 0:
            return t
    return n


# ---------------------------------------------------------------------------
# Kernel 1: fused QKV projection, head-split output layout (3, B, H, T, hd)
# ---------------------------------------------------------------------------
def _qkv_proj_kernel(x_ref, w_ref, qkvh_ref):
    # x_ref: (1, tm, D)   w_ref: (1, 1, D, hd)   qkvh_ref: (1, 1, 1, tm, hd)
    x = x_ref[0]                        # (tm, D)   compute dtype (bf16)
    w = w_ref[0, 0]                     # (D, hd)   compute dtype (bf16)
    y = jnp.dot(x, w, preferred_element_type=jnp.float32)
    qkvh_ref[0, 0, 0] = y.astype(qkvh_ref.dtype)


# ---------------------------------------------------------------------------
# Kernel 2: flash attention (online softmax over kv tiles) with the output
#           projection fused in (accumulated over heads into the output tile)
# ---------------------------------------------------------------------------
def _flash_attn_kernel(q_ref, k_ref, v_ref, wout_ref, o_ref,
                       m_sc, l_sc, acc_sc, oacc_sc, *, n_head, compute_dtype):
    h = pl.program_id(2)
    kv = pl.program_id(3)
    nkv = pl.num_programs(3)

    @pl.when(kv == 0)
    def _init_softmax_state():
        m_sc[...] = jnp.full_like(m_sc, -jnp.inf)
        l_sc[...] = jnp.zeros_like(l_sc)
        acc_sc[...] = jnp.zeros_like(acc_sc)

    @pl.when(jnp.logical_and(h == 0, kv == 0))
    def _init_out_accumulator():
        oacc_sc[...] = jnp.zeros_like(oacc_sc)

    q = q_ref[0, 0, 0]                  # (tq,  hd)  bf16
    k = k_ref[0, 0, 0]                  # (tkv, hd)  bf16
    v = v_ref[0, 0, 0]                  # (tkv, hd)  bf16

    # scores (tq, tkv): q @ k^T on the MXU, f32 accumulation.
    # The 1/head_dim logit scaling is pre-folded into the q weights.
    s = jax.lax.dot_general(q, k, (((1,), (1,)), ((), ())),
                            preferred_element_type=jnp.float32)

    # Online softmax update (f32 statistics).
    m_prev = m_sc[...]
    m_new = jnp.maximum(m_prev, jnp.max(s, axis=-1, keepdims=True))
    alpha = jnp.exp(m_prev - m_new)           # exp(-inf)=0 on the first step
    p = jnp.exp(s - m_new)
    l_sc[...] = alpha * l_sc[...] + jnp.sum(p, axis=-1, keepdims=True)
    acc_sc[...] = alpha * acc_sc[...] + jnp.dot(
        p.astype(compute_dtype), v, preferred_element_type=jnp.float32)
    m_sc[...] = m_new

    @pl.when(kv == nkv - 1)
    def _finalize():
        # Normalize once per q tile (EUP reciprocal, not a full-tensor divide),
        # then fold this head's contribution through its slice of W_out.
        inv_l = pl.reciprocal(l_sc[...], approx=(compute_dtype == jnp.bfloat16))
        wv = (acc_sc[...] * inv_l).astype(compute_dtype)          # (tq, hd)
        contrib = jnp.dot(wv, wout_ref[0],
                          preferred_element_type=jnp.float32)     # (tq, D)
        oacc_sc[...] = oacc_sc[...] + contrib

        @pl.when(h == n_head - 1)
        def _write_out():
            o_ref[0] = oacc_sc[...].astype(o_ref.dtype)


# ---------------------------------------------------------------------------
# Wrapper
# ---------------------------------------------------------------------------
def attention_forward(x, w_qkv, w_out, n_head, *, compute_dtype=jnp.bfloat16,
                      q_tile=512, kv_tile=512, proj_tile=512):
    """x: (B, T, D); w_qkv: (3D, D) torch layout; w_out: (D, D) torch layout."""
    B, T, D = x.shape
    assert D % n_head == 0, "dim must be divisible by n_head"
    hd = D // n_head
    scale = 1.0 / math.sqrt(hd)

    tm = _pick_tile(T, proj_tile)
    tq = _pick_tile(T, q_tile)
    tkv = _pick_tile(T, kv_tile)
    nt, nq, nkv = T // tm, T // tq, T // tkv

    # --- one-time weight preprocessing (XLA, cheap, done on weights only) ---
    # torch: y = x @ W.T ; qkv columns ordered [q | k | v], each split by head.
    w_qkv_heads = (jnp.transpose(w_qkv)                    # (D, 3D)
                   .reshape(D, 3, n_head, hd)
                   .transpose(1, 2, 0, 3))                 # (3, H, D, hd)
    # fold both scale multiplies (q*scale and k*scale) into the q weights once
    w_qkv_heads = w_qkv_heads.at[0].multiply(scale * scale)
    w_qkv_heads = w_qkv_heads.astype(compute_dtype)
    w_out_heads = (jnp.transpose(w_out)                    # (D, D)
                   .reshape(n_head, hd, D)                 # (H, hd, D)
                   .astype(compute_dtype))
    x_c = x.astype(compute_dtype)

    itemsize = jnp.dtype(compute_dtype).itemsize
    out_itemsize = jnp.dtype(x.dtype).itemsize

    # ------------------------- kernel 1: QKV projection -------------------------
    qkvh = pl.pallas_call(
        _qkv_proj_kernel,
        out_shape=jax.ShapeDtypeStruct((3, B, n_head, T, hd), compute_dtype),
        grid_spec=pltpu.PrefetchScalarGridSpec(
            num_scalar_prefetch=0,
            grid=(B, nt, 3, n_head),
            in_specs=[
                pl.BlockSpec((1, tm, D), lambda b, ti, s, h: (b, ti, 0)),
                pl.BlockSpec((1, 1, D, hd), lambda b, ti, s, h: (s, h, 0, 0)),
            ],
            out_specs=pl.BlockSpec((1, 1, 1, tm, hd),
                                   lambda b, ti, s, h: (s, b, h, ti, 0)),
        ),
        compiler_params=pltpu.CompilerParams(
            dimension_semantics=("parallel", "parallel", "parallel", "parallel"),
            vmem_limit_bytes=32 * 1024 * 1024),
        cost_estimate=pl.CostEstimate(
            flops=2 * B * T * D * 3 * D,
            transcendentals=0,
            bytes_accessed=(B * T * D + 3 * D * D + 3 * B * T * D) * itemsize),
    )(x_c, w_qkv_heads)

    # -------------- kernel 2: flash attention + fused output projection --------------
    kernel = functools.partial(_flash_attn_kernel, n_head=n_head,
                               compute_dtype=compute_dtype)
    out = pl.pallas_call(
        kernel,
        out_shape=jax.ShapeDtypeStruct((B, T, D), x.dtype),
        grid_spec=pltpu.PrefetchScalarGridSpec(
            num_scalar_prefetch=0,
            grid=(B, nq, n_head, nkv),
            in_specs=[
                pl.BlockSpec((1, 1, 1, tq, hd),
                             lambda b, qi, h, kv: (0, b, h, qi, 0)),   # q tile
                pl.BlockSpec((1, 1, 1, tkv, hd),
                             lambda b, qi, h, kv: (1, b, h, kv, 0)),   # k tile
                pl.BlockSpec((1, 1, 1, tkv, hd),
                             lambda b, qi, h, kv: (2, b, h, kv, 0)),   # v tile
                pl.BlockSpec((1, hd, D),
                             lambda b, qi, h, kv: (h, 0, 0)),          # W_out[h]
            ],
            out_specs=pl.BlockSpec((1, tq, D), lambda b, qi, h, kv: (b, qi, 0)),
            scratch_shapes=[
                pltpu.VMEM((tq, 1), jnp.float32),    # running max
                pltpu.VMEM((tq, 1), jnp.float32),    # running sum
                pltpu.VMEM((tq, hd), jnp.float32),   # per-head accumulator
                pltpu.VMEM((tq, D), jnp.float32),    # output (post-proj) accum
            ],
        ),
        compiler_params=pltpu.CompilerParams(
            dimension_semantics=("parallel", "parallel", "arbitrary", "arbitrary"),
            vmem_limit_bytes=32 * 1024 * 1024),
        cost_estimate=pl.CostEstimate(
            flops=4 * B * n_head * T * T * hd + 2 * B * T * D * D,
            transcendentals=B * n_head * T * T,
            bytes_accessed=(B * n_head * T * hd * (1 + 2 * nq) + D * D) * itemsize
                           + B * T * D * out_itemsize),
    )(qkvh, qkvh, qkvh, w_out_heads)

    return out


# ---------------------------------------------------------------------------
# Pure-JAX reference mirroring the PyTorch module exactly
# ---------------------------------------------------------------------------
def attention_reference(x, w_qkv, w_out, n_head):
    B, T, D = x.shape
    hd = D // n_head
    scale = 1.0 / math.sqrt(hd)
    qkv = x @ w_qkv.T                                               # (B, T, 3D)
    q, k, v = qkv[..., :D], qkv[..., D:2 * D], qkv[..., 2 * D:]
    q = q.reshape(B, T, n_head, hd).transpose(0, 2, 1, 3) * scale   # (B,H,T,hd)
    k = k.reshape(B, T, n_head, hd).transpose(0, 2, 3, 1) * scale   # (B,H,hd,T)
    v = v.reshape(B, T, n_head, hd).transpose(0, 2, 1, 3)           # (B,H,T,hd)
    qk = q @ k                                                      # (B,H,T,T)
    w = jax.nn.softmax(qk.astype(jnp.float32), axis=-1).astype(q.dtype)
    wv = (w @ v).transpose(0, 2, 1, 3).reshape(B, T, D)
    return wv @ w_out.T


if __name__ == "__main__":
    # Small but alignment-friendly shapes: several heads, Whisper-like head_dim.
    B, T, D, H = 2, 512, 256, 4   # head_dim = 64

    key = jax.random.PRNGKey(0)
    kx, kq, ko = jax.random.split(key, 3)

    x = jax.random.normal(kx, (B, T, D), dtype=jnp.float32)
    # nn.Linear default init ~ U(-1/sqrt(in), 1/sqrt(in)); deterministic here.
    bound = 1.0 / math.sqrt(D)
    w_qkv = jax.random.uniform(kq, (3 * D, D), jnp.float32, -bound, bound)
    w_out = jax.random.uniform(ko, (D, D), jnp.float32, -bound, bound)

    ref = attention_reference(x, w_qkv, w_out, H)

    # Production path: bf16 MXU operands, f32 accumulation / softmax stats,
    # large (512) tiles.
    out_bf16 = jax.block_until_ready(
        attention_forward(x, w_qkv, w_out, H, compute_dtype=jnp.bfloat16))
    assert out_bf16.shape == (B, T, D)
    assert jnp.allclose(out_bf16, ref, atol=2e-2, rtol=2e-2), "bf16 mismatch"

    # High-precision path with small tiles: exercises the multi-kv-step online
    # softmax and multi-q-tile paths of the same kernels.
    out_f32 = jax.block_until_ready(
        attention_forward(x, w_qkv, w_out, H, compute_dtype=jnp.float32,
                          q_tile=128, kv_tile=128, proj_tile=256))
    assert jnp.allclose(out_f32, ref, atol=2e-2, rtol=2e-2), "f32 mismatch"

    print("KERNEL_OK")
</pallas_src>

<mosaic_0001>
module attributes {stable_mosaic.version = 11 : i64} {
  func.func @_qkv_proj_kernel(%arg0: i32, %arg1: i32, %arg2: i32, %arg3: i32, %arg4: memref<1x512x256xbf16, #tpu.memory_space<vmem>>, %arg5: memref<1x1x256x64xbf16, #tpu.memory_space<vmem>>, %arg6: memref<1x1x1x512x64xbf16, #tpu.memory_space<vmem>>) attributes {dimension_semantics = [#tpu.dimension_semantics<parallel>, #tpu.dimension_semantics<parallel>, #tpu.dimension_semantics<parallel>, #tpu.dimension_semantics<parallel>], iteration_bounds = array<i64: 2, 1, 3, 4>, scalar_prefetch = 0 : i64, scratch_operands = 0 : i64, tpu.core_type = #tpu.core_type<tc>, window_params = [{transform_indices = @transform_0, window_bounds = array<i64: 1, 512, 256>}, {transform_indices = @transform_1, window_bounds = array<i64: 1, 1, 256, 64>}, {transform_indices = @transform_2, window_bounds = array<i64: 1, 1, 1, 512, 64>}]} {
    %c0 = arith.constant 0 : index
    %c0_0 = arith.constant 0 : index
    %c0_1 = arith.constant 0 : index
    %0 = vector.load %arg4[%c0, %c0_0, %c0_1] : memref<1x512x256xbf16, #tpu.memory_space<vmem>>, vector<1x512x256xbf16>
    %1 = vector.shape_cast %0 : vector<1x512x256xbf16> to vector<512x256xbf16>
    %c0_2 = arith.constant 0 : index
    %c0_3 = arith.constant 0 : index
    %c0_4 = arith.constant 0 : index
    %c0_5 = arith.constant 0 : index
    %2 = vector.load %arg5[%c0_2, %c0_3, %c0_4, %c0_5] : memref<1x1x256x64xbf16, #tpu.memory_space<vmem>>, vector<1x1x256x64xbf16>
    %3 = vector.shape_cast %2 : vector<1x1x256x64xbf16> to vector<256x64xbf16>
    %cst = arith.constant dense<0.000000e+00> : vector<512x64xf32>
    %4 = tpu.matmul %1, %3, %cst {dimension_numbers = #tpu.dot_dimension_numbers<[1], [0], [0], [1], [0, 0, 1, 1], [], []>} : vector<512x256xbf16>, vector<256x64xbf16>, vector<512x64xf32> -> vector<512x64xf32>
    %5 = arith.truncf %4 : vector<512x64xf32> to vector<512x64xbf16>
    %c0_6 = arith.constant 0 : index
    %c0_7 = arith.constant 0 : index
    %c0_8 = arith.constant 0 : index
    %c0_9 = arith.constant 0 : index
    %c0_10 = arith.constant 0 : index
    %6 = vector.load %arg6[%c0_6, %c0_7, %c0_8, %c0_9, %c0_10] : memref<1x1x1x512x64xbf16, #tpu.memory_space<vmem>>, vector<1x1x1x512x64xbf16>
    %7 = vector.shape_cast %6 : vector<1x1x1x512x64xbf16> to vector<512x64xbf16>
    %8 = vector.shape_cast %5 : vector<512x64xbf16> to vector<1x1x1x512x64xbf16>
    tpu.vector_store %arg6[%c0_6, %c0_7, %c0_8, %c0_9, %c0_10], %8 {strides = array<i32>} : memref<1x1x1x512x64xbf16, #tpu.memory_space<vmem>>, vector<1x1x1x512x64xbf16>,
    return
  }
  func.func @transform_0(%arg0: i32, %arg1: i32, %arg2: i32, %arg3: i32) -> (i32, i32, i32) {
    %c0_i32 = arith.constant 0 : i32
    %c0_i32_0 = arith.constant 0 : i32
    return %arg0, %arg1, %c0_i32 : i32, i32, i32
  }
  func.func @transform_1(%arg0: i32, %arg1: i32, %arg2: i32, %arg3: i32) -> (i32, i32, i32, i32) {
    %c0_i32 = arith.constant 0 : i32
    %c0_i32_0 = arith.constant 0 : i32
    %c0_i32_1 = arith.constant 0 : i32
    return %arg2, %arg3, %c0_i32, %c0_i32_0 : i32, i32, i32, i32
  }
  func.func @transform_2(%arg0: i32, %arg1: i32, %arg2: i32, %arg3: i32) -> (i32, i32, i32, i32, i32) {
    %c0_i32 = arith.constant 0 : i32
    %c0_i32_0 = arith.constant 0 : i32
    return %arg2, %arg0, %arg3, %arg1, %c0_i32 : i32, i32, i32, i32, i32
  }
}

</mosaic_0001>

<bundles_post_ra>
// kernel: tpu_custom_call.1
= control target key start
LH: loop header
LB: loop body
LE: loop exit
PB: predicated region body
PF: predicated region fallthrough
CT: control target
= control target key end

     0   :  { %7 = vsyncpa [#allocation3], 0  ;;  %s2566_s0 = inlined_call_operand.hbm [shape: bf16[2,512,256], index: 0, kind: input, shape index: {}]   ;;  %s2567_s1 = inlined_call_operand.vmem [shape: bf16[3,4,256,64], index: 1, kind: input, shape index: {}]   ;;  %s2568_s2 = inlined_call_operand.vmem [shape: bf16[3,2,4,512,64], index: 2, kind: output, shape index: {}]  }
   0x1   :  { %9 = vsyncpa [#allocation3 + $0x1], 0  ;;  %s2138_s9 = smov 0   ;;  %s2140_s10 = smov 0  }
   0x2   :  { %s2142_s11 = smov 0   ;;  %s2144_s12 = smov 0  }
   0x3   :  { %s2146_s13 = smov 0   ;;  %s2148_s14 = smov 0  }
   0x4   :  { %s2150_s15 = smov 0   ;;  %s2152_s16 = smov 0  }
   0x5   :  { %s2154_s17 = smov 0   ;;  %s2156_s18 = smov 0  }
   0x6 LB: > { %s1544_s19 = sadd.s32 4294967295, %s2117_s18   ;;  %s30_s20 = sadd.s32 1, %s2105_s15  ;;  %s2117_s18 = sphi %s2156_s18, %s15_s18   ;;  %s2113_s17 = sphi %s2154_s17, %s2580_s17   ;;  %s2109_s16 = sphi %s2152_s16, %s2579_s16   ;;  %s2105_s15 = sphi %s2150_s15, %s2578_s15   ;;  %s2101_s14 = sphi %s2148_s14, %s2577_s14   ;;  %s2097_s13 = sphi %s2146_s13, %s2576_s13   ;;  %s2093_s12 = sphi %s2144_s12, %s2575_s12   ;;  %s2089_s11 = sphi %s2142_s11, %s2574_s11   ;;  %s2085_s10 = sphi %s2140_s10, %s2573_s10   ;;  %s2081_s9 = sphi %s2138_s9, %s2572_s9  }
   0x7   : > { %p31_p0 = scmp.ge.s32.totalorder %s30_s20, 4  ;;  %s33_s21 = sadd.s32 1, %s2109_s16 }
   0x8   : > { %s41_s22 = sadd.s32 1, %s2113_s17  ;;  %s50_s23 = sadd.s32 1, %s2089_s11 }
   0x9   : > { %s2582_s20 = smov (%p31_p0, %s30_s20), 0  ;;  %s2584_s21 = smov (!%p31_p0, %s33_s21), %s2109_s16 }
   0xa   : > { %p57_p1 = scmp.ne.s32.totalorder %s2089_s11, %s2085_s10  ;;  %p58_p2 = scmp.eq.s32.totalorder %s2117_s18, 0 }
   0xb   : > { %p35_p3 = scmp.ge.s32.totalorder %s2584_s21, 3  ;;  %p63_p4 = scmp.ne.s32.totalorder %s2085_s10, %s2081_s9 }
   0xc   : > { %p2198_p5 = por %p58_p2, %p57_p1  ;;  %p64_p6 = scmp.eq.s32.totalorder %s1544_s19, 0 }
   0xd   : > { %s2586_s21 = smov (%p35_p3, %s2584_s21), 0  ;;  %s2588_s22 = smov (!%p35_p3, %s41_s22), %s2113_s17 }
   0xe   : > { %p2205_p7 = por %p64_p6, %p63_p4  ;;  %p43_p8 = scmp.ge.s32.totalorder %s2588_s22, 2 }
   0xf   : > { %p1809_p9 = scmp.lt.s32.totalorder %s2117_s18, 24  ;;  %s147_s26 = sand.u32 1, %s2089_s11  }
  0x10   : > { %s1706_s27 = sshll.u32 %s2113_s17, 13  ;;  %s2590_s22 = smov (%p43_p8, %s2588_s22), 0 }
  0x11   : > { %s1548_s28 = sshll.u32 %s147_s26, 9  ;;  %s45_s29 = ssub.s32 %s2113_s17, %s2590_s22 }
  0x12   : > { %p48_p10 = scmp.eq.s32.totalorder %s45_s29, 0  ;;  %s2219_s4 = scalar_lea.hbm %s2566_s0, %s1706_s27 }
  0x13   : > { %s151_s5 = scalar_lea.vmem [#allocation2], %s1548_s28  ;;  %p2223_p11 = pnand %p1809_p9, %p2198_p5 }
  0x14   : > { %s161_s6 = sshll.u32 %s151_s5, 4  ;;  %s2232_s9 = scalar_lea.sflag [#allocation3], %s147_s26  ;;  %s2230_s6 = int_to_ptr.vmem [resolvable:$true] %s161_s6 }
  0x15   : > { %s2228_s8 = scalar_select %p48_p10, %s2089_s11, %s50_s23  }
  0x16   : > { %s2005_s19 = scalar_lea.hbm %s2219_s4, 8192  ;;  %p2007_p13 = pneg %p2223_p11 }
  0x17   : > { %p2006_p12 = scmp.ne.s32.totalorder %s2219_s4, %s2005_s19  ;;  %s2010_s28 = scalar_lea.hbm %s2566_s0, 16384 }
  0x18   : > { %p2011_p2 = scmp.lt.u32.totalorder %s2219_s4, %s2566_s0  ;;  %p2012_p3 = scmp.lt.u32.totalorder %s2010_s28, %s2005_s19 }
  0x19   : > { %p2008_p0 = pnand %p2007_p13, %p2006_p12  ;;  %p2014_p5 = scmp.lt.u32.totalorder %s2005_s19, %s2219_s4 }
  0x1a   : > { %p2013_p4 = por %p2012_p3, %p2011_p2 }
  0x1b   : > { %p2009_p1 = pneg %p2008_p0 }
  0x1c   : > { %p2015_p6 = por %p2014_p5, %p2013_p4 }
  0x1e   : > { %p2016_p8 = pnand %p2015_p6, %p2009_p1 }
  0x20   : > { %2019 = shalt.err (!%p2016_p8)
}
  0x21   : > { %s2020_s23 = scalar_lea.vmem %s2230_s6, 8192  ;;  %s2119_s26 = smov [#allocation2]  }
  0x22   : > { %p2021_p9 = scmp.ne.s32.totalorder %s2230_s6, %s2020_s23  ;;  %s2025_s3 = sshll.u32 %s2119_s26, 4  ;;  %s2026_s3 = int_to_ptr.vmem [resolvable:$false] %s2025_s3 }
  0x23   : > { %s2027_s5 = scalar_lea.vmem %s2026_s3, 16384  ;;  %p2028_p0 = scmp.lt.s32.totalorder %s2230_s6, %s2026_s3 }
  0x24   : > { %p2023_p10 = pnand %p2021_p9, %p2007_p13  ;;  %p2029_p2 = scmp.lt.s32.totalorder %s2027_s5, %s2020_s23 }
  0x26   : > { %p2024_p12 = pneg %p2023_p10  ;;  %p2030_p3 = por %p2029_p2, %p2028_p0 }
  0x28   : > { %p2031_p4 = pnand %p2030_p3, %p2024_p12 }
  0x2a   : > { %2034 = shalt.err (!%p2031_p4)
}
  0x2b   : > { %s2120_s19 = smov 128   ;;  %s2121_s24 = smov 8  }
  0x2c   : > { %1808 = dma.hbm_to_vmem [thread:$0]  (!%p2223_p11), %s2219_s4, 8192, %s2230_s6, %s2232_s9, %s2120_s19, %s2120_s19, %s2121_s24  }
  0x2d   : > { %p1551_p13 = scmp.ge.s32.totalorder %s2117_s18, 1  ;;  %p181_p1 = scmp.lt.s32.totalorder %s2117_s18, 25 }
  0x2f   : > { %p182_p5 = pnand %p1551_p13, %p181_p1 }
  0x30   : > { %s187_s27 = sand.u32 (!%p182_p5), 1, %s2085_s10  }
  0x31   : > { %185 = sbr.rel (%p182_p5) target bundleno = 465 (0x1d1), region = 28  ;;  %s1552_s28 = sshll.u32 (!%p182_p5), %s187_s27, 9 }
  0x32   : > { %s188_s29 = scalar_lea.sflag (!%p182_p5), [#allocation3], %s187_s27  ;;  %s2263_s30 = scalar_lea.vmem (!%p182_p5), [#allocation2], %s1552_s28 }
  0x38   : > { %2076 = dma.done.wait (%p2205_p7), %s188_s29, 8192  }
  0x39   : > { %2078 = vsyncadd (%p2205_p7), %s188_s29, 4294959104  ;;  %p234_p11 = scmp.lt.s32.totalorder %s2097_s13, 2  ;;  %p236_p6 = scmp.lt.s32.totalorder %s2093_s12, 3  ;;  %v2122_v0 = vmov 0   ;;  %v1911_v1 = vld [vmem:[%s2263_s30 + $0x4] ss:$8 sps:$4 sm:$0xff]  }
  0x3a   : > { %774 = vmatprep.subr.bf16.mxu0 %v2122_v0  ;;  %1771 = vmatprep.subr.bf16.mxu1 %v2122_v0  ;;  %v1914_v7 = vld [vmem:[%s2263_s30 + $0x104] ss:$8 sps:$4 sm:$0xff]   ;;  %p246_p7 = scmp.lt.s32.totalorder %s2101_s14, 1  ;;  %v1909_v19 = vld [vmem:[%s2263_s30] ss:$8 sps:$4 sm:$0xff]   ;;  %vm1319_vm0 = vcmask 519168  }
  0x3b   : > { %s2592_s13 = smov (!%p234_p11, %s2097_s13), 2  ;;  %s2594_s12 = smov (!%p236_p6, %s2093_s12), 3  ;;  %806 = vmatprep.mubr.bf16.mxu0 %v1911_v1  ;;  %934 = vmatprep.mubr.bf16.mxu1 %v1914_v7  ;;  %v1912_v20 = vld [vmem:[%s2263_s30 + $0x100] ss:$8 sps:$4 sm:$0xff]   ;;  %v1915_v21 = vld [vmem:[%s2263_s30 + $0x14] ss:$8 sps:$4 sm:$0xff]  }
  0x3c   : > { %s1554_s25 = sshll.u32 %s2592_s13, 7  ;;  %s1553_s4 = sshll.u32 %s2594_s12, 5  ;;  %v1917_v22 = vld [vmem:[%s2263_s30 + $0x114] ss:$8 sps:$4 sm:$0xff]   ;;  %v1919_v23 = vld [vmem:[%s2263_s30 + $0x10] ss:$8 sps:$4 sm:$0xff]  }
  0x3d   : > { %s240_s6 = sadd.s32 %s1554_s25, %s1553_s4  ;;  %s1556_s3 = sshll.u32 %s2594_s12, 6  ;;  %v1920_v24 = vld [vmem:[%s2263_s30 + $0x110] ss:$8 sps:$4 sm:$0xff]   ;;  %v1921_v25 = vld [vmem:[%s2263_s30 + $0x24] ss:$8 sps:$4 sm:$0xff]  }
  0x3e   : > { %s1555_s7 = sshll.u32 %s240_s6, 2  ;;  %s2596_s14 = smov (!%p246_p7, %s2101_s14), 1  ;;  %v1923_v26 = vld [vmem:[%s2263_s30 + $0x124] ss:$8 sps:$4 sm:$0xff]   ;;  %v1925_v27 = vld [vmem:[%s2263_s30 + $0x20] ss:$8 sps:$4 sm:$0xff]  }
  0x3f   : > { %s2284_s26 = scalar_lea.vmem %s2567_s1, %s1555_s7  ;;  %s1558_s5 = sshll.u32 %s2592_s13, 9  ;;  %v1926_v28 = vld [vmem:[%s2263_s30 + $0x120] ss:$8 sps:$4 sm:$0xff]   ;;  %v1927_v29 = vld [vmem:[%s2263_s30 + $0x34] ss:$8 sps:$4 sm:$0xff]  }
  0x40   : > { %v1893_v2 = vld [vmem:[%s2284_s26] sm:$0xff]   ;;  %v1894_v3 = vld [vmem:[%s2284_s26 + $0x8] sm:$0xff]   ;;  %v1895_v4 = vld [vmem:[%s2284_s26 + $0x10] sm:$0xff]   ;;  %s1557_s19 = sshll.u32 %s2596_s14, 8 }
  0x41   : > { %775 = vmatpush1.bf16.msra.mxu0 %v1893_v2  ;;  %1787 = vmatpush1.bf16.msra.mxu1 %v1893_v2  ;;  %v1896_v5 = vld [vmem:[%s2284_s26 + $0x18] sm:$0xff]   ;;  %v1897_v6 = vld [vmem:[%s2284_s26 + $0x20] sm:$0xff]   ;;  %v1898_v8 = vld [vmem:[%s2284_s26 + $0x28] sm:$0xff]   ;;  %s255_s12 = sadd.s32 %s1557_s19, %s1556_s3 }
  0x42   : > { %776 = vmatprep.subr.bf16.mxu0 %v2122_v0  ;;  %1772 = vmatprep.subr.bf16.mxu1 %v2122_v0  ;;  %v1899_v9 = vld [vmem:[%s2284_s26 + $0x30] sm:$0xff]   ;;  %v1900_v10 = vld [vmem:[%s2284_s26 + $0x38] sm:$0xff]   ;;  %v1901_v11 = vld [vmem:[%s2284_s26 + $0x40] sm:$0xff]   ;;  %s2342_s24 = sadd.s32 %s1558_s5, %s255_s12 }
  0x43   : > { %v1902_v12 = vld [vmem:[%s2284_s26 + $0x48] sm:$0xff]   ;;  %v1903_v13 = vld [vmem:[%s2284_s26 + $0x50] sm:$0xff]   ;;  %v1904_v14 = vld [vmem:[%s2284_s26 + $0x58] sm:$0xff]   ;;  %s1559_s13 = sshll.u32 %s2342_s24, 2 }
  0x44   : > { %v1905_v15 = vld [vmem:[%s2284_s26 + $0x60] sm:$0xff]   ;;  %v1906_v16 = vld [vmem:[%s2284_s26 + $0x68] sm:$0xff]   ;;  %v1907_v17 = vld [vmem:[%s2284_s26 + $0x70] sm:$0xff]   ;;  %s2406_s28 = scalar_lea.vmem %s2568_s2, %s1559_s13 }
  0x45   : > { %777 = vmatpush1.bf16.msra.mxu0 %v1894_v3  ;;  %1788 = vmatpush1.bf16.msra.mxu1 %v1894_v3  ;;  %v1908_v18 = vld [vmem:[%s2284_s26 + $0x78] sm:$0xff]   ;;  %v1933_v33 = vld [vmem:[%s2263_s30 + $0x44] ss:$8 sps:$4 sm:$0xff]   ;;  %v1937_v35 = vld [vmem:[%s2263_s30 + $0x40] ss:$8 sps:$4 sm:$0xff]  }
  0x46   : > { %778 = vmatprep.subr.bf16.mxu0 %v2122_v0  ;;  %1773 = vmatprep.subr.bf16.mxu1 %v2122_v0  ;;  %v1929_v30 = vld [vmem:[%s2263_s30 + $0x134] ss:$8 sps:$4 sm:$0xff]   ;;  %v1931_v31 = vld [vmem:[%s2263_s30 + $0x30] ss:$8 sps:$4 sm:$0xff]   ;;  %v1935_v34 = vld [vmem:[%s2263_s30 + $0x144] ss:$8 sps:$4 sm:$0xff]  }
  0x47   : > { %v1932_v32 = vld [vmem:[%s2263_s30 + $0x130] ss:$8 sps:$4 sm:$0xff]   ;;  %v1938_v36 = vld [vmem:[%s2263_s30 + $0x140] ss:$8 sps:$4 sm:$0xff]   ;;  %v1939_v37 = vld [vmem:[%s2263_s30 + $0x54] ss:$8 sps:$4 sm:$0xff]  }
  0x48   : > { %v1941_v38 = vld [vmem:[%s2263_s30 + $0x154] ss:$8 sps:$4 sm:$0xff]   ;;  %v1943_v39 = vld [vmem:[%s2263_s30 + $0x50] ss:$8 sps:$4 sm:$0xff]   ;;  %v1945_v41 = vld [vmem:[%s2263_s30 + $0x64] ss:$8 sps:$4 sm:$0xff]  }
  0x49   : > { %779 = vmatpush1.bf16.msra.mxu0 %v1895_v4  ;;  %1789 = vmatpush1.bf16.msra.mxu1 %v1895_v4  ;;  %v1944_v40 = vld [vmem:[%s2263_s30 + $0x150] ss:$8 sps:$4 sm:$0xff]   ;;  %v1947_v42 = vld [vmem:[%s2263_s30 + $0x164] ss:$8 sps:$4 sm:$0xff]   ;;  %v1949_v43 = vld [vmem:[%s2263_s30 + $0x60] ss:$8 sps:$4 sm:$0xff]  }
  0x4a   : > { %780 = vmatprep.subr.bf16.mxu0 %v2122_v0  ;;  %1774 = vmatprep.subr.bf16.mxu1 %v2122_v0  ;;  %v1950_v44 = vld [vmem:[%s2263_s30 + $0x160] ss:$8 sps:$4 sm:$0xff]   ;;  %v1951_v45 = vld [vmem:[%s2263_s30 + $0x74] ss:$8 sps:$4 sm:$0xff]   ;;  %v1955_v47 = vld [vmem:[%s2263_s30 + $0x70] ss:$8 sps:$4 sm:$0xff]  }
  0x4b   : > { %v1953_v46 = vld [vmem:[%s2263_s30 + $0x174] ss:$8 sps:$4 sm:$0xff]   ;;  %v1956_v48 = vld [vmem:[%s2263_s30 + $0x170] ss:$8 sps:$4 sm:$0xff]   ;;  %v1957_v49 = vld [vmem:[%s2263_s30 + $0x84] ss:$8 sps:$4 sm:$0xff]  }
  0x4c   : > { %v1959_v50 = vld [vmem:[%s2263_s30 + $0x184] ss:$8 sps:$4 sm:$0xff]   ;;  %v1961_v51 = vld [vmem:[%s2263_s30 + $0x80] ss:$8 sps:$4 sm:$0xff]   ;;  %v1963_v53 = vld [vmem:[%s2263_s30 + $0x94] ss:$8 sps:$4 sm:$0xff]  }
  0x4d   : > { %781 = vmatpush1.bf16.msra.mxu0 %v1896_v5  ;;  %1790 = vmatpush1.bf16.msra.mxu1 %v1896_v5  ;;  %v1962_v52 = vld [vmem:[%s2263_s30 + $0x180] ss:$8 sps:$4 sm:$0xff]   ;;  %v1965_v54 = vld [vmem:[%s2263_s30 + $0x194] ss:$8 sps:$4 sm:$0xff]   ;;  %v1967_v55 = vld [vmem:[%s2263_s30 + $0x90] ss:$8 sps:$4 sm:$0xff]  }
  0x4e   : > { %782 = vmatprep.subr.bf16.mxu0 %v2122_v0  ;;  %1775 = vmatprep.subr.bf16.mxu1 %v2122_v0  ;;  %v1968_v56 = vld [vmem:[%s2263_s30 + $0x190] ss:$8 sps:$4 sm:$0xff]   ;;  %v1969_v57 = vld [vmem:[%s2263_s30 + $0xa4] ss:$8 sps:$4 sm:$0xff]   ;;  %v1973_v59 = vld [vmem:[%s2263_s30 + $0xa0] ss:$8 sps:$4 sm:$0xff]  }
  0x4f   : > { %v1971_v58 = vld [vmem:[%s2263_s30 + $0x1a4] ss:$8 sps:$4 sm:$0xff]   ;;  %v1974_v60 = vld [vmem:[%s2263_s30 + $0x1a0] ss:$8 sps:$4 sm:$0xff]   ;;  %v1975_v61 = vld [vmem:[%s2263_s30 + $0xb4] ss:$8 sps:$4 sm:$0xff]  }
  0x50   : > { %v1977_v62 = vld [vmem:[%s2263_s30 + $0x1b4] ss:$8 sps:$4 sm:$0xff]   ;;  %v1979_v63 = vld [vmem:[%s2263_s30 + $0xb0] ss:$8 sps:$4 sm:$0xff]   ;;  %v1981_v1 = vld [vmem:[%s2263_s30 + $0xc4] ss:$8 sps:$4 sm:$0xff]  }
  0x51   : > { %783 = vmatpush1.bf16.msra.mxu0 %v1897_v6  ;;  %1791 = vmatpush1.bf16.msra.mxu1 %v1897_v6  ;;  %v1983_v2 = vld [vmem:[%s2263_s30 + $0x1c4] ss:$8 sps:$4 sm:$0xff]   ;;  %v1985_v3 = vld [vmem:[%s2263_s30 + $0xc0] ss:$8 sps:$4 sm:$0xff]   ;;  %v1987_v5 = vld [vmem:[%s2263_s30 + $0xd4] ss:$8 sps:$4 sm:$0xff]  }
  0x52   : > { %784 = vmatprep.subr.bf16.mxu0 %v2122_v0  ;;  %1776 = vmatprep.subr.bf16.mxu1 %v2122_v0  ;;  %v1986_v4 = vld [vmem:[%s2263_s30 + $0x1c0] ss:$8 sps:$4 sm:$0xff]   ;;  %v1989_v6 = vld [vmem:[%s2263_s30 + $0x1d4] ss:$8 sps:$4 sm:$0xff]   ;;  %v1991_v7 = vld [vmem:[%s2263_s30 + $0xd0] ss:$8 sps:$4 sm:$0xff]  }
  0x55   : > { %785 = vmatpush1.bf16.msra.mxu0 %v1898_v8  ;;  %1792 = vmatpush1.bf16.msra.mxu1 %v1898_v8  ;;  %v1992_v8 = vld [vmem:[%s2263_s30 + $0x1d0] ss:$8 sps:$4 sm:$0xff]  }
  0x56   : > { %786 = vmatprep.subr.bf16.mxu0 %v2122_v0  ;;  %1777 = vmatprep.subr.bf16.mxu1 %v2122_v0 }
  0x59   : > { %787 = vmatpush1.bf16.msra.mxu0 %v1899_v9  ;;  %1793 = vmatpush1.bf16.msra.mxu1 %v1899_v9  ;;  %v1993_v9 = vld [vmem:[%s2263_s30 + $0xe4] ss:$8 sps:$4 sm:$0xff]  }
  0x5a   : > { %788 = vmatprep.subr.bf16.mxu0 %v2122_v0  ;;  %1778 = vmatprep.subr.bf16.mxu1 %v2122_v0 }
  0x5d   : > { %789 = vmatpush1.bf16.msra.mxu0 %v1900_v10  ;;  %1794 = vmatpush1.bf16.msra.mxu1 %v1900_v10  ;;  %v1995_v10 = vld [vmem:[%s2263_s30 + $0x1e4] ss:$8 sps:$4 sm:$0xff]  }
  0x5e   : > { %790 = vmatprep.subr.bf16.mxu0 %v2122_v0  ;;  %1779 = vmatprep.subr.bf16.mxu1 %v2122_v0 }
  0x61   : > { %791 = vmatpush1.bf16.msra.mxu0 %v1901_v11  ;;  %1795 = vmatpush1.bf16.msra.mxu1 %v1901_v11  ;;  %v1997_v11 = vld [vmem:[%s2263_s30 + $0xe0] ss:$8 sps:$4 sm:$0xff]  }
  0x62   : > { %792 = vmatprep.subr.bf16.mxu0 %v2122_v0  ;;  %1780 = vmatprep.subr.bf16.mxu1 %v2122_v0 }
  0x65   : > { %793 = vmatpush1.bf16.msra.mxu0 %v1902_v12  ;;  %1796 = vmatpush1.bf16.msra.mxu1 %v1902_v12  ;;  %v1998_v12 = vld [vmem:[%s2263_s30 + $0x1e0] ss:$8 sps:$4 sm:$0xff]  }
  0x66   : > { %794 = vmatprep.subr.bf16.mxu0 %v2122_v0  ;;  %1781 = vmatprep.subr.bf16.mxu1 %v2122_v0 }
  0x69   : > { %795 = vmatpush1.bf16.msra.mxu0 %v1903_v13  ;;  %1797 = vmatpush1.bf16.msra.mxu1 %v1903_v13  ;;  %v1999_v13 = vld [vmem:[%s2263_s30 + $0xf4] ss:$8 sps:$4 sm:$0xff]  }
  0x6a   : > { %796 = vmatprep.subr.bf16.mxu0 %v2122_v0  ;;  %1782 = vmatprep.subr.bf16.mxu1 %v2122_v0 }
  0x6d   : > { %797 = vmatpush1.bf16.msra.mxu0 %v1904_v14  ;;  %1798 = vmatpush1.bf16.msra.mxu1 %v1904_v14  ;;  %v2001_v14 = vld [vmem:[%s2263_s30 + $0x1f4] ss:$8 sps:$4 sm:$0xff]  }
  0x6e   : > { %798 = vmatprep.subr.bf16.mxu0 %v2122_v0  ;;  %1783 = vmatprep.subr.bf16.mxu1 %v2122_v0 }
  0x71   : > { %799 = vmatpush1.bf16.msra.mxu0 %v1905_v15  ;;  %1799 = vmatpush1.bf16.msra.mxu1 %v1905_v15  ;;  %v2003_v15 = vld [vmem:[%s2263_s30 + $0xf0] ss:$8 sps:$4 sm:$0xff]  }
  0x72   : > { %800 = vmatprep.subr.bf16.mxu0 %v2122_v0  ;;  %1784 = vmatprep.subr.bf16.mxu1 %v2122_v0 }
  0x75   : > { %801 = vmatpush1.bf16.msra.mxu0 %v1906_v16  ;;  %1800 = vmatpush1.bf16.msra.mxu1 %v1906_v16  ;;  %v2004_v16 = vld [vmem:[%s2263_s30 + $0x1f0] ss:$8 sps:$4 sm:$0xff]  }
  0x76   : > { %802 = vmatprep.subr.bf16.mxu0 %v2122_v0  ;;  %1785 = vmatprep.subr.bf16.mxu1 %v2122_v0 }
  0x79   : > { %803 = vmatpush1.bf16.msra.mxu0 %v1907_v17  ;;  %1801 = vmatpush1.bf16.msra.mxu1 %v1907_v17 }
  0x7a   : > { %804 = vmatprep.subr.bf16.mxu0 %v2122_v0  ;;  %1786 = vmatprep.subr.bf16.mxu1 %v2122_v0  ;;  %v1980_v0 = vld [vmem:[%s2263_s30 + $0x1b0] ss:$8 sps:$4 sm:$0xff]  }
  0x7d   : > { %805 = vmatpush1.bf16.msra.mxu0 %v1908_v18  ;;  %1802 = vmatpush1.bf16.msra.mxu1 %v1908_v18 }
  0x80   : > { %807 = vmatmul.mubr.bf16.vlgmr.msra.gmra.mrb[0].mxu0 %v1909_v19  ;;  %935 = vmatmul.mubr.bf16.vlgmr.msra.gmra.mrb[0].mxu1 %v1912_v20 }
  0x81   : > { %814 = vmatprep.mubr.bf16.mxu0 %v1915_v21  ;;  %942 = vmatprep.mubr.bf16.mxu1 %v1917_v22 }
  0x88   : > { %815 = vmatmul.mubr.bf16.gmra.mrb[4].mxu0 %v1919_v23  ;;  %943 = vmatmul.mubr.bf16.gmra.mrb[4].mxu1 %v1920_v24 }
  0x89   : > { %822 = vmatprep.mubr.bf16.mxu0 %v1921_v25  ;;  %950 = vmatprep.mubr.bf16.mxu1 %v1923_v26 }
  0x90   : > { %823 = vmatmul.mubr.bf16.gmra.mrb[8].mxu0 %v1925_v27  ;;  %951 = vmatmul.mubr.bf16.gmra.mrb[8].mxu1 %v1926_v28 }
  0x91   : > { %830 = vmatprep.mubr.bf16.mxu0 %v1927_v29  ;;  %958 = vmatprep.mubr.bf16.mxu1 %v1929_v30 }
  0x98   : > { %831 = vmatmul.mubr.bf16.gmra.mrb[12].mxu0 %v1931_v31  ;;  %959 = vmatmul.mubr.bf16.gmra.mrb[12].mxu1 %v1932_v32 }
  0x99   : > { %838 = vmatprep.mubr.bf16.mxu0 %v1933_v33  ;;  %966 = vmatprep.mubr.bf16.mxu1 %v1935_v34 }
  0xa0   : > { %839 = vmatmul.mubr.bf16.gmra.mrb[16].mxu0 %v1937_v35  ;;  %967 = vmatmul.mubr.bf16.gmra.mrb[16].mxu1 %v1938_v36 }
  0xa1   : > { %846 = vmatprep.mubr.bf16.mxu0 %v1939_v37  ;;  %974 = vmatprep.mubr.bf16.mxu1 %v1941_v38 }
  0xa8   : > { %847 = vmatmul.mubr.bf16.gmra.mrb[20].mxu0 %v1943_v39  ;;  %975 = vmatmul.mubr.bf16.gmra.mrb[20].mxu1 %v1944_v40 }
  0xa9   : > { %854 = vmatprep.mubr.bf16.mxu0 %v1945_v41  ;;  %982 = vmatprep.mubr.bf16.mxu1 %v1947_v42 }
  0xb0   : > { %855 = vmatmul.mubr.bf16.gmra.mrb[24].mxu0 %v1949_v43  ;;  %983 = vmatmul.mubr.bf16.gmra.mrb[24].mxu1 %v1950_v44 }
  0xb1   : > { %862 = vmatprep.mubr.bf16.mxu0 %v1951_v45  ;;  %990 = vmatprep.mubr.bf16.mxu1 %v1953_v46 }
  0xb8   : > { %863 = vmatmul.mubr.bf16.gmra.mrb[28].mxu0 %v1955_v47  ;;  %991 = vmatmul.mubr.bf16.gmra.mrb[28].mxu1 %v1956_v48 }
  0xb9   : > { %870 = vmatprep.mubr.bf16.mxu0 %v1957_v49  ;;  %998 = vmatprep.mubr.bf16.mxu1 %v1959_v50 }
  0xc0   : > { %871 = vmatmul.mubr.bf16.gmra.mrb[32].mxu0 %v1961_v51  ;;  %999 = vmatmul.mubr.bf16.gmra.mrb[32].mxu1 %v1962_v52 }
  0xc1   : > { %878 = vmatprep.mubr.bf16.mxu0 %v1963_v53  ;;  %1006 = vmatprep.mubr.bf16.mxu1 %v1965_v54 }
  0xc8   : > { %879 = vmatmul.mubr.bf16.gmra.mrb[36].mxu0 %v1967_v55  ;;  %1007 = vmatmul.mubr.bf16.gmra.mrb[36].mxu1 %v1968_v56 }
  0xc9   : > { %886 = vmatprep.mubr.bf16.mxu0 %v1969_v57  ;;  %1014 = vmatprep.mubr.bf16.mxu1 %v1971_v58 }
  0xd0   : > { %887 = vmatmul.mubr.bf16.gmra.mrb[40].mxu0 %v1973_v59  ;;  %1015 = vmatmul.mubr.bf16.gmra.mrb[40].mxu1 %v1974_v60 }
  0xd1   : > { %894 = vmatprep.mubr.bf16.mxu0 %v1975_v61  ;;  %1022 = vmatprep.mubr.bf16.mxu1 %v1977_v62 }
  0xd8   : > { %895 = vmatmul.mubr.bf16.gmra.mrb[44].mxu0 %v1979_v63  ;;  %1023 = vmatmul.mubr.bf16.gmra.mrb[44].mxu1 %v1980_v0 }
  0xd9   : > { %902 = vmatprep.mubr.bf16.mxu0 %v1981_v1  ;;  %1030 = vmatprep.mubr.bf16.mxu1 %v1983_v2 }
  0xe0   : > { %903 = vmatmul.mubr.bf16.gmra.mrb[48].mxu0 %v1985_v3  ;;  %1031 = vmatmul.mubr.bf16.gmra.mrb[48].mxu1 %v1986_v4 }
  0xe1   : > { %910 = vmatprep.mubr.bf16.mxu0 %v1987_v5  ;;  %1038 = vmatprep.mubr.bf16.mxu1 %v1989_v6 }
  0xe8   : > { %911 = vmatmul.mubr.bf16.gmra.mrb[52].mxu0 %v1991_v7  ;;  %1039 = vmatmul.mubr.bf16.gmra.mrb[52].mxu1 %v1992_v8 }
  0xe9   : > { %918 = vmatprep.mubr.bf16.mxu0 %v1993_v9  ;;  %1046 = vmatprep.mubr.bf16.mxu1 %v1995_v10 }
  0xf0   : > { %919 = vmatmul.mubr.bf16.gmra.mrb[56].mxu0 %v1997_v11  ;;  %1047 = vmatmul.mubr.bf16.gmra.mrb[56].mxu1 %v1998_v12 }
  0xf1   : > { %926 = vmatprep.mubr.bf16.mxu0 %v1999_v13  ;;  %1054 = vmatprep.mubr.bf16.mxu1 %v2001_v14 }
  0xf8   : > { %927 = vmatmul.mubr.bf16.gmra.mrb[60].mxu0 %v2003_v15  ;;  %1055 = vmatmul.mubr.bf16.gmra.mrb[60].mxu1 %v2004_v16 }
 0x153   : > { %v808_v17 = vpop.f32.mrb[0].mxu0  ;;  %v936_v18 = vpop.f32.mrb[0].mxu1 }
 0x154   : > { %v1707_v19 = vpack.c.bf16 %v808_v17, %v808_v17  ;;  %v1739_v20 = vpack.c.bf16 %v936_v18, %v936_v18  ;;  %v810_v21 = vpop.f32.mrb[1].mxu0  ;;  %v938_v22 = vpop.f32.mrb[1].mxu1 }
 0x155   : > { %v811_v23 = vpop.f32.mrb[2].mxu0  ;;  %v939_v24 = vpop.f32.mrb[2].mxu1 }
 0x156   : > { %1320 = vst.msk [vmem:[%s2406_s28] sm:$0xf] %vm1319_vm0, %v1707_v19  ;;  %1352 = vst.msk [vmem:[%s2406_s28 + $0x80] sm:$0xf] %vm1319_vm0, %v1739_v20  ;;  %v1708_v25 = vpack.c.bf16 %v811_v23, %v811_v23  ;;  %v1740_v26 = vpack.c.bf16 %v939_v24, %v939_v24  ;;  %v813_v27 = vpop.f32.mrb[3].mxu0  ;;  %v941_v28 = vpop.f32.mrb[3].mxu1 }
 0x158   : > { %1321 = vst.msk [vmem:[%s2406_s28 + $0x4] sm:$0xf] %vm1319_vm0, %v1708_v25  ;;  %1353 = vst.msk [vmem:[%s2406_s28 + $0x84] sm:$0xf] %vm1319_vm0, %v1740_v26 }
 0x15b   : > { %v816_v29 = vpop.f32.mrb[4].mxu0  ;;  %v944_v30 = vpop.f32.mrb[4].mxu1 }
 0x15c   : > { %v1709_v31 = vpack.c.bf16 %v816_v29, %v816_v29  ;;  %v1741_v32 = vpack.c.bf16 %v944_v30, %v944_v30  ;;  %v818_v33 = vpop.f32.mrb[5].mxu0  ;;  %v946_v34 = vpop.f32.mrb[5].mxu1 }
 0x15d   : > { %v819_v35 = vpop.f32.mrb[6].mxu0  ;;  %v947_v36 = vpop.f32.mrb[6].mxu1 }
 0x15e   : > { %1322 = vst.msk [vmem:[%s2406_s28 + $0x8] sm:$0xf] %vm1319_vm0, %v1709_v31  ;;  %1354 = vst.msk [vmem:[%s2406_s28 + $0x88] sm:$0xf] %vm1319_vm0, %v1741_v32  ;;  %v1710_v37 = vpack.c.bf16 %v819_v35, %v819_v35  ;;  %v1742_v38 = vpack.c.bf16 %v947_v36, %v947_v36  ;;  %v821_v39 = vpop.f32.mrb[7].mxu0  ;;  %v949_v40 = vpop.f32.mrb[7].mxu1 }
 0x160   : > { %1323 = vst.msk [vmem:[%s2406_s28 + $0xc] sm:$0xf] %vm1319_vm0, %v1710_v37  ;;  %1355 = vst.msk [vmem:[%s2406_s28 + $0x8c] sm:$0xf] %vm1319_vm0, %v1742_v38 }
 0x163   : > { %v824_v41 = vpop.f32.mrb[8].mxu0  ;;  %v952_v42 = vpop.f32.mrb[8].mxu1 }
 0x164   : > { %v1711_v43 = vpack.c.bf16 %v824_v41, %v824_v41  ;;  %v1743_v44 = vpack.c.bf16 %v952_v42, %v952_v42  ;;  %v826_v45 = vpop.f32.mrb[9].mxu0  ;;  %v954_v46 = vpop.f32.mrb[9].mxu1 }
 0x165   : > { %v827_v47 = vpop.f32.mrb[10].mxu0  ;;  %v955_v48 = vpop.f32.mrb[10].mxu1 }
 0x166   : > { %1324 = vst.msk [vmem:[%s2406_s28 + $0x10] sm:$0xf] %vm1319_vm0, %v1711_v43  ;;  %1356 = vst.msk [vmem:[%s2406_s28 + $0x90] sm:$0xf] %vm1319_vm0, %v1743_v44  ;;  %v1712_v49 = vpack.c.bf16 %v827_v47, %v827_v47  ;;  %v1744_v50 = vpack.c.bf16 %v955_v48, %v955_v48  ;;  %v829_v51 = vpop.f32.mrb[11].mxu0  ;;  %v957_v52 = vpop.f32.mrb[11].mxu1 }
 0x168   : > { %1325 = vst.msk [vmem:[%s2406_s28 + $0x14] sm:$0xf] %vm1319_vm0, %v1712_v49  ;;  %1357 = vst.msk [vmem:[%s2406_s28 + $0x94] sm:$0xf] %vm1319_vm0, %v1744_v50 }
 0x16b   : > { %v832_v53 = vpop.f32.mrb[12].mxu0  ;;  %v960_v54 = vpop.f32.mrb[12].mxu1 }
 0x16c   : > { %v1713_v55 = vpack.c.bf16 %v832_v53, %v832_v53  ;;  %v1745_v56 = vpack.c.bf16 %v960_v54, %v960_v54  ;;  %v834_v57 = vpop.f32.mrb[13].mxu0  ;;  %v962_v58 = vpop.f32.mrb[13].mxu1 }
 0x16d   : > { %v835_v59 = vpop.f32.mrb[14].mxu0  ;;  %v963_v60 = vpop.f32.mrb[14].mxu1 }
 0x16e   : > { %1326 = vst.msk [vmem:[%s2406_s28 + $0x18] sm:$0xf] %vm1319_vm0, %v1713_v55  ;;  %1358 = vst.msk [vmem:[%s2406_s28 + $0x98] sm:$0xf] %vm1319_vm0, %v1745_v56  ;;  %v1714_v61 = vpack.c.bf16 %v835_v59, %v835_v59  ;;  %v1746_v62 = vpack.c.bf16 %v963_v60, %v963_v60  ;;  %v837_v63 = vpop.f32.mrb[15].mxu0  ;;  %v965_v0 = vpop.f32.mrb[15].mxu1 }
 0x170   : > { %1327 = vst.msk [vmem:[%s2406_s28 + $0x1c] sm:$0xf] %vm1319_vm0, %v1714_v61  ;;  %1359 = vst.msk [vmem:[%s2406_s28 + $0x9c] sm:$0xf] %vm1319_vm0, %v1746_v62 }
 0x173   : > { %v840_v1 = vpop.f32.mrb[16].mxu0  ;;  %v968_v2 = vpop.f32.mrb[16].mxu1 }
 0x174   : > { %v1715_v3 = vpack.c.bf16 %v840_v1, %v840_v1  ;;  %v1747_v4 = vpack.c.bf16 %v968_v2, %v968_v2  ;;  %v842_v5 = vpop.f32.mrb[17].mxu0  ;;  %v970_v6 = vpop.f32.mrb[17].mxu1 }
 0x175   : > { %v843_v7 = vpop.f32.mrb[18].mxu0  ;;  %v971_v8 = vpop.f32.mrb[18].mxu1 }
 0x176   : > { %1328 = vst.msk [vmem:[%s2406_s28 + $0x20] sm:$0xf] %vm1319_vm0, %v1715_v3  ;;  %1360 = vst.msk [vmem:[%s2406_s28 + $0xa0] sm:$0xf] %vm1319_vm0, %v1747_v4  ;;  %v1716_v9 = vpack.c.bf16 %v843_v7, %v843_v7  ;;  %v1748_v10 = vpack.c.bf16 %v971_v8, %v971_v8  ;;  %v845_v11 = vpop.f32.mrb[19].mxu0  ;;  %v973_v12 = vpop.f32.mrb[19].mxu1 }
 0x178   : > { %1329 = vst.msk [vmem:[%s2406_s28 + $0x24] sm:$0xf] %vm1319_vm0, %v1716_v9  ;;  %1361 = vst.msk [vmem:[%s2406_s28 + $0xa4] sm:$0xf] %vm1319_vm0, %v1748_v10 }
 0x17b   : > { %v848_v13 = vpop.f32.mrb[20].mxu0  ;;  %v976_v14 = vpop.f32.mrb[20].mxu1 }
 0x17c   : > { %v1717_v15 = vpack.c.bf16 %v848_v13, %v848_v13  ;;  %v1749_v16 = vpack.c.bf16 %v976_v14, %v976_v14  ;;  %v850_v17 = vpop.f32.mrb[21].mxu0  ;;  %v978_v18 = vpop.f32.mrb[21].mxu1 }
 0x17d   : > { %v851_v19 = vpop.f32.mrb[22].mxu0  ;;  %v979_v20 = vpop.f32.mrb[22].mxu1 }
 0x17e   : > { %1330 = vst.msk [vmem:[%s2406_s28 + $0x28] sm:$0xf] %vm1319_vm0, %v1717_v15  ;;  %1362 = vst.msk [vmem:[%s2406_s28 + $0xa8] sm:$0xf] %vm1319_vm0, %v1749_v16  ;;  %v1718_v21 = vpack.c.bf16 %v851_v19, %v851_v19  ;;  %v1750_v22 = vpack.c.bf16 %v979_v20, %v979_v20  ;;  %v853_v23 = vpop.f32.mrb[23].mxu0  ;;  %v981_v24 = vpop.f32.mrb[23].mxu1 }
 0x180   : > { %1331 = vst.msk [vmem:[%s2406_s28 + $0x2c] sm:$0xf] %vm1319_vm0, %v1718_v21  ;;  %1363 = vst.msk [vmem:[%s2406_s28 + $0xac] sm:$0xf] %vm1319_vm0, %v1750_v22 }
 0x183   : > { %v856_v25 = vpop.f32.mrb[24].mxu0  ;;  %v984_v26 = vpop.f32.mrb[24].mxu1 }
 0x184   : > { %v1719_v27 = vpack.c.bf16 %v856_v25, %v856_v25  ;;  %v1751_v28 = vpack.c.bf16 %v984_v26, %v984_v26  ;;  %v858_v29 = vpop.f32.mrb[25].mxu0  ;;  %v986_v30 = vpop.f32.mrb[25].mxu1 }
 0x185   : > { %v859_v31 = vpop.f32.mrb[26].mxu0  ;;  %v987_v32 = vpop.f32.mrb[26].mxu1 }
 0x186   : > { %1332 = vst.msk [vmem:[%s2406_s28 + $0x30] sm:$0xf] %vm1319_vm0, %v1719_v27  ;;  %1364 = vst.msk [vmem:[%s2406_s28 + $0xb0] sm:$0xf] %vm1319_vm0, %v1751_v28  ;;  %v1720_v33 = vpack.c.bf16 %v859_v31, %v859_v31  ;;  %v1752_v34 = vpack.c.bf16 %v987_v32, %v987_v32  ;;  %v861_v35 = vpop.f32.mrb[27].mxu0  ;;  %v989_v36 = vpop.f32.mrb[27].mxu1 }
 0x188   : > { %1333 = vst.msk [vmem:[%s2406_s28 + $0x34] sm:$0xf] %vm1319_vm0, %v1720_v33  ;;  %1365 = vst.msk [vmem:[%s2406_s28 + $0xb4] sm:$0xf] %vm1319_vm0, %v1752_v34 }
 0x18b   : > { %v864_v37 = vpop.f32.mrb[28].mxu0  ;;  %v992_v38 = vpop.f32.mrb[28].mxu1 }
 0x18c   : > { %v1721_v39 = vpack.c.bf16 %v864_v37, %v864_v37  ;;  %v1753_v40 = vpack.c.bf16 %v992_v38, %v992_v38  ;;  %v866_v41 = vpop.f32.mrb[29].mxu0  ;;  %v994_v42 = vpop.f32.mrb[29].mxu1 }
 0x18d   : > { %v867_v43 = vpop.f32.mrb[30].mxu0  ;;  %v995_v44 = vpop.f32.mrb[30].mxu1 }
 0x18e   : > { %1334 = vst.msk [vmem:[%s2406_s28 + $0x38] sm:$0xf] %vm1319_vm0, %v1721_v39  ;;  %1366 = vst.msk [vmem:[%s2406_s28 + $0xb8] sm:$0xf] %vm1319_vm0, %v1753_v40  ;;  %v1722_v45 = vpack.c.bf16 %v867_v43, %v867_v43  ;;  %v1754_v46 = vpack.c.bf16 %v995_v44, %v995_v44  ;;  %v869_v47 = vpop.f32.mrb[31].mxu0  ;;  %v997_v48 = vpop.f32.mrb[31].mxu1 }
 0x190   : > { %1335 = vst.msk [vmem:[%s2406_s28 + $0x3c] sm:$0xf] %vm1319_vm0, %v1722_v45  ;;  %1367 = vst.msk [vmem:[%s2406_s28 + $0xbc] sm:$0xf] %vm1319_vm0, %v1754_v46 }
 0x193   : > { %v872_v49 = vpop.f32.mrb[32].mxu0  ;;  %v1000_v50 = vpop.f32.mrb[32].mxu1 }
 0x194   : > { %v1723_v51 = vpack.c.bf16 %v872_v49, %v872_v49  ;;  %v1755_v52 = vpack.c.bf16 %v1000_v50, %v1000_v50  ;;  %v874_v53 = vpop.f32.mrb[33].mxu0  ;;  %v1002_v54 = vpop.f32.mrb[33].mxu1 }
 0x195   : > { %v875_v55 = vpop.f32.mrb[34].mxu0  ;;  %v1003_v56 = vpop.f32.mrb[34].mxu1 }
 0x196   : > { %1336 = vst.msk [vmem:[%s2406_s28 + $0x40] sm:$0xf] %vm1319_vm0, %v1723_v51  ;;  %1368 = vst.msk [vmem:[%s2406_s28 + $0xc0] sm:$0xf] %vm1319_vm0, %v1755_v52  ;;  %v1724_v57 = vpack.c.bf16 %v875_v55, %v875_v55  ;;  %v1756_v58 = vpack.c.bf16 %v1003_v56, %v1003_v56  ;;  %v877_v59 = vpop.f32.mrb[35].mxu0  ;;  %v1005_v60 = vpop.f32.mrb[35].mxu1 }
 0x198   : > { %1337 = vst.msk [vmem:[%s2406_s28 + $0x44] sm:$0xf] %vm1319_vm0, %v1724_v57  ;;  %1369 = vst.msk [vmem:[%s2406_s28 + $0xc4] sm:$0xf] %vm1319_vm0, %v1756_v58 }
 0x19b   : > { %v880_v61 = vpop.f32.mrb[36].mxu0  ;;  %v1008_v62 = vpop.f32.mrb[36].mxu1 }
 0x19c   : > { %v1725_v63 = vpack.c.bf16 %v880_v61, %v880_v61  ;;  %v1757_v0 = vpack.c.bf16 %v1008_v62, %v1008_v62  ;;  %v882_v1 = vpop.f32.mrb[37].mxu0  ;;  %v1010_v2 = vpop.f32.mrb[37].mxu1 }
 0x19d   : > { %v883_v3 = vpop.f32.mrb[38].mxu0  ;;  %v1011_v4 = vpop.f32.mrb[38].mxu1 }
 0x19e   : > { %1338 = vst.msk [vmem:[%s2406_s28 + $0x48] sm:$0xf] %vm1319_vm0, %v1725_v63  ;;  %1370 = vst.msk [vmem:[%s2406_s28 + $0xc8] sm:$0xf] %vm1319_vm0, %v1757_v0  ;;  %v1726_v5 = vpack.c.bf16 %v883_v3, %v883_v3  ;;  %v1758_v6 = vpack.c.bf16 %v1011_v4, %v1011_v4  ;;  %v885_v7 = vpop.f32.mrb[39].mxu0  ;;  %v1013_v8 = vpop.f32.mrb[39].mxu1 }
 0x1a0   : > { %1339 = vst.msk [vmem:[%s2406_s28 + $0x4c] sm:$0xf] %vm1319_vm0, %v1726_v5  ;;  %1371 = vst.msk [vmem:[%s2406_s28 + $0xcc] sm:$0xf] %vm1319_vm0, %v1758_v6 }
 0x1a3   : > { %v888_v9 = vpop.f32.mrb[40].mxu0  ;;  %v1016_v10 = vpop.f32.mrb[40].mxu1 }
 0x1a4   : > { %v1727_v11 = vpack.c.bf16 %v888_v9, %v888_v9  ;;  %v1759_v12 = vpack.c.bf16 %v1016_v10, %v1016_v10  ;;  %v890_v13 = vpop.f32.mrb[41].mxu0  ;;  %v1018_v14 = vpop.f32.mrb[41].mxu1 }
 0x1a5   : > { %v891_v15 = vpop.f32.mrb[42].mxu0  ;;  %v1019_v16 = vpop.f32.mrb[42].mxu1 }
 0x1a6   : > { %1340 = vst.msk [vmem:[%s2406_s28 + $0x50] sm:$0xf] %vm1319_vm0, %v1727_v11  ;;  %1372 = vst.msk [vmem:[%s2406_s28 + $0xd0] sm:$0xf] %vm1319_vm0, %v1759_v12  ;;  %v1728_v17 = vpack.c.bf16 %v891_v15, %v891_v15  ;;  %v1760_v18 = vpack.c.bf16 %v1019_v16, %v1019_v16  ;;  %v893_v19 = vpop.f32.mrb[43].mxu0  ;;  %v1021_v20 = vpop.f32.mrb[43].mxu1 }
 0x1a8   : > { %1341 = vst.msk [vmem:[%s2406_s28 + $0x54] sm:$0xf] %vm1319_vm0, %v1728_v17  ;;  %1373 = vst.msk [vmem:[%s2406_s28 + $0xd4] sm:$0xf] %vm1319_vm0, %v1760_v18 }
 0x1ab   : > { %v896_v21 = vpop.f32.mrb[44].mxu0  ;;  %v1024_v22 = vpop.f32.mrb[44].mxu1 }
 0x1ac   : > { %v1729_v23 = vpack.c.bf16 %v896_v21, %v896_v21  ;;  %v1761_v24 = vpack.c.bf16 %v1024_v22, %v1024_v22  ;;  %v898_v25 = vpop.f32.mrb[45].mxu0  ;;  %v1026_v26 = vpop.f32.mrb[45].mxu1 }
 0x1ad   : > { %v899_v27 = vpop.f32.mrb[46].mxu0  ;;  %v1027_v28 = vpop.f32.mrb[46].mxu1 }
 0x1ae   : > { %1342 = vst.msk [vmem:[%s2406_s28 + $0x58] sm:$0xf] %vm1319_vm0, %v1729_v23  ;;  %1374 = vst.msk [vmem:[%s2406_s28 + $0xd8] sm:$0xf] %vm1319_vm0, %v1761_v24  ;;  %v1730_v29 = vpack.c.bf16 %v899_v27, %v899_v27  ;;  %v1762_v30 = vpack.c.bf16 %v1027_v28, %v1027_v28  ;;  %v901_v31 = vpop.f32.mrb[47].mxu0  ;;  %v1029_v32 = vpop.f32.mrb[47].mxu1 }
 0x1b0   : > { %1343 = vst.msk [vmem:[%s2406_s28 + $0x5c] sm:$0xf] %vm1319_vm0, %v1730_v29  ;;  %1375 = vst.msk [vmem:[%s2406_s28 + $0xdc] sm:$0xf] %vm1319_vm0, %v1762_v30 }
 0x1b3   : > { %v904_v33 = vpop.f32.mrb[48].mxu0  ;;  %v1032_v34 = vpop.f32.mrb[48].mxu1 }
 0x1b4   : > { %v1731_v35 = vpack.c.bf16 %v904_v33, %v904_v33  ;;  %v1763_v36 = vpack.c.bf16 %v1032_v34, %v1032_v34  ;;  %v906_v37 = vpop.f32.mrb[49].mxu0  ;;  %v1034_v38 = vpop.f32.mrb[49].mxu1 }
 0x1b5   : > { %v907_v39 = vpop.f32.mrb[50].mxu0  ;;  %v1035_v40 = vpop.f32.mrb[50].mxu1 }
 0x1b6   : > { %1344 = vst.msk [vmem:[%s2406_s28 + $0x60] sm:$0xf] %vm1319_vm0, %v1731_v35  ;;  %1376 = vst.msk [vmem:[%s2406_s28 + $0xe0] sm:$0xf] %vm1319_vm0, %v1763_v36  ;;  %v1732_v41 = vpack.c.bf16 %v907_v39, %v907_v39  ;;  %v1764_v42 = vpack.c.bf16 %v1035_v40, %v1035_v40  ;;  %v909_v43 = vpop.f32.mrb[51].mxu0  ;;  %v1037_v44 = vpop.f32.mrb[51].mxu1 }
 0x1b8   : > { %1345 = vst.msk [vmem:[%s2406_s28 + $0x64] sm:$0xf] %vm1319_vm0, %v1732_v41  ;;  %1377 = vst.msk [vmem:[%s2406_s28 + $0xe4] sm:$0xf] %vm1319_vm0, %v1764_v42 }
 0x1bb   : > { %v912_v45 = vpop.f32.mrb[52].mxu0  ;;  %v1040_v46 = vpop.f32.mrb[52].mxu1 }
 0x1bc   : > { %v1733_v47 = vpack.c.bf16 %v912_v45, %v912_v45  ;;  %v1765_v48 = vpack.c.bf16 %v1040_v46, %v1040_v46  ;;  %v914_v49 = vpop.f32.mrb[53].mxu0  ;;  %v1042_v50 = vpop.f32.mrb[53].mxu1 }
 0x1bd   : > { %v915_v51 = vpop.f32.mrb[54].mxu0  ;;  %v1043_v52 = vpop.f32.mrb[54].mxu1 }
 0x1be   : > { %1346 = vst.msk [vmem:[%s2406_s28 + $0x68] sm:$0xf] %vm1319_vm0, %v1733_v47  ;;  %1378 = vst.msk [vmem:[%s2406_s28 + $0xe8] sm:$0xf] %vm1319_vm0, %v1765_v48  ;;  %v1734_v53 = vpack.c.bf16 %v915_v51, %v915_v51  ;;  %v1766_v54 = vpack.c.bf16 %v1043_v52, %v1043_v52  ;;  %v917_v55 = vpop.f32.mrb[55].mxu0  ;;  %v1045_v56 = vpop.f32.mrb[55].mxu1 }
 0x1c0   : > { %1347 = vst.msk [vmem:[%s2406_s28 + $0x6c] sm:$0xf] %vm1319_vm0, %v1734_v53  ;;  %1379 = vst.msk [vmem:[%s2406_s28 + $0xec] sm:$0xf] %vm1319_vm0, %v1766_v54 }
 0x1c3   : > { %v920_v57 = vpop.f32.mrb[56].mxu0  ;;  %v1048_v58 = vpop.f32.mrb[56].mxu1 }
 0x1c4   : > { %v1735_v59 = vpack.c.bf16 %v920_v57, %v920_v57  ;;  %v1767_v60 = vpack.c.bf16 %v1048_v58, %v1048_v58  ;;  %v922_v61 = vpop.f32.mrb[57].mxu0  ;;  %v1050_v62 = vpop.f32.mrb[57].mxu1 }
 0x1c5   : > { %v923_v63 = vpop.f32.mrb[58].mxu0  ;;  %v1051_v0 = vpop.f32.mrb[58].mxu1 }
 0x1c6   : > { %1348 = vst.msk [vmem:[%s2406_s28 + $0x70] sm:$0xf] %vm1319_vm0, %v1735_v59  ;;  %1380 = vst.msk [vmem:[%s2406_s28 + $0xf0] sm:$0xf] %vm1319_vm0, %v1767_v60  ;;  %v1736_v1 = vpack.c.bf16 %v923_v63, %v923_v63  ;;  %v1768_v2 = vpack.c.bf16 %v1051_v0, %v1051_v0  ;;  %v925_v3 = vpop.f32.mrb[59].mxu0  ;;  %v1053_v4 = vpop.f32.mrb[59].mxu1 }
 0x1c8   : > { %1349 = vst.msk [vmem:[%s2406_s28 + $0x74] sm:$0xf] %vm1319_vm0, %v1736_v1  ;;  %1381 = vst.msk [vmem:[%s2406_s28 + $0xf4] sm:$0xf] %vm1319_vm0, %v1768_v2 }
 0x1cb   : > { %v928_v5 = vpop.f32.mrb[60].mxu0  ;;  %v1056_v6 = vpop.f32.mrb[60].mxu1 }
 0x1cc   : > { %v1737_v7 = vpack.c.bf16 %v928_v5, %v928_v5  ;;  %v1769_v8 = vpack.c.bf16 %v1056_v6, %v1056_v6  ;;  %v930_v9 = vpop.f32.mrb[61].mxu0  ;;  %v1058_v10 = vpop.f32.mrb[61].mxu1 }
 0x1cd   : > { %v931_v11 = vpop.f32.mrb[62].mxu0  ;;  %v1059_v12 = vpop.f32.mrb[62].mxu1 }
 0x1ce   : > { %1350 = vst.msk [vmem:[%s2406_s28 + $0x78] sm:$0xf] %vm1319_vm0, %v1737_v7  ;;  %1382 = vst.msk [vmem:[%s2406_s28 + $0xf8] sm:$0xf] %vm1319_vm0, %v1769_v8  ;;  %v1738_v13 = vpack.c.bf16 %v931_v11, %v931_v11  ;;  %v1770_v14 = vpack.c.bf16 %v1059_v12, %v1059_v12  ;;  %v933_v15 = vpop.f32.mrb[63].mxu0  ;;  %v1061_v16 = vpop.f32.mrb[63].mxu1 }
 0x1d0   : > { %1351 = vst.msk [vmem:[%s2406_s28 + $0x7c] sm:$0xf] %vm1319_vm0, %v1738_v13  ;;  %1383 = vst.msk [vmem:[%s2406_s28 + $0xfc] sm:$0xf] %vm1319_vm0, %v1770_v14 }
 0x1d1 PF: > { %s15_s18 = sadd.s32 1, %s2117_s18   ;;  %s2572_s9 = smov %s2085_s10 }
 0x1d2   : > { %p12_p8 = scmp.ge.s32.totalorder %s15_s18, 26   ;;  %s2573_s10 = smov %s2089_s11 }
 0x1d3   : > { %s2574_s11 = smov %s2228_s8  ;;  %s2575_s12 = smov %s2105_s15 }
 0x1d4   : > { %s2576_s13 = smov %s2109_s16  ;;  %s2577_s14 = smov %s2113_s17 }
 0x1d5   : > { %s2578_s15 = smov %s2582_s20  ;;  %s2579_s16 = smov %s2586_s21 }
 0x1d6   : > { %s2580_s17 = smov %s2590_s22  ;;  %14 = sbr.rel (!%p12_p8) target bundleno = 6 (0x6), region = 71 }
 0x1dd   :  { %1430 = vsyncpa [#allocation3], 1 }
 0x1de   :  { %1432 = vsyncpa [#allocation3 + $0x1], 1 }

</bundles_post_ra>
